<compile_context>
chip_gen: v5e
topology: v5e:2x2
jax: 0.10.0
libtpu: 0.0.40
codegen_flags: <defaults>
</compile_context>

<pallas_src>
import functools

import jax
import jax.numpy as jnp
from jax.experimental import pallas as pl
from jax.experimental.pallas import tpu as pltpu

IN_PAD = 8    # input features (x, y, t) zero-padded 3 -> 8 (one sublane tile)
OUT_PAD = 8   # output channels (u, v)  zero-padded 2 -> 8 (one sublane tile)


def _mlp_kernel(w_in_ref, b_in_ref, w_hid_ref, b_hid_ref,
                w_out_ref, b_out_ref, x_ref, o_ref, *, num_hidden):
    # Layout: features on sublanes, batch on lanes -> h is (F, TM), fully
    # lane-dense.  Input normalization 2*(x-lb)/(ub-lb)-1 was folded into
    # (w_in, b_in) at trace time, so the kernel starts directly at layer 0.
    h = jnp.tanh(
        jnp.dot(w_in_ref[...], x_ref[...], preferred_element_type=jnp.float32)
        + b_in_ref[...])                                   # (F, TM)

    # Hidden layers (F -> F) + tanh.  Static Python unroll; per-layer Ref
    # indexing keeps only one layer's weights live at a time.
    for l in range(num_hidden):
        h = jnp.tanh(
            jnp.dot(w_hid_ref[l], h, preferred_element_type=jnp.float32)
            + b_hid_ref[l])

    # Output layer (F -> OUT_PAD rows, zero-padded from 2), no activation.
    # (OUT_PAD, TM) store is sublane-aligned and lane-dense (unmasked vst).
    o_ref[...] = (
        jnp.dot(w_out_ref[...], h, preferred_element_type=jnp.float32)
        + b_out_ref[...])


def schrodinger_forward(x, params, *, tm=512):
    """x: (N, 3) float32 -> (N, 2) float32 (u, v)."""
    (lb, ub, w_in, b_in, w_hid, b_hid, w_out, b_out) = params
    N = x.shape[0]
    num_hidden = w_hid.shape[0]
    F = w_in.shape[1]
    n_out = w_out.shape[1]

    # --- trace-time parameter preprocessing -------------------------------
    # Fold 2*(x - lb)/(ub - lb) - 1 into the first Linear:
    #   norm(x) = x * s + c,  s = 2/(ub-lb),  c = -2*lb/(ub-lb) - 1
    #   => w_in' = s^T * w_in,  b_in' = b_in + c @ w_in
    s = 2.0 / (ub - lb)                                    # (1, 3)
    c = -2.0 * lb / (ub - lb) - 1.0                        # (1, 3)
    w_in_eff = s.reshape(3, 1) * w_in                      # (3, F)
    b_in_eff = b_in + c @ w_in                             # (1, F)

    # Transpose all parameters to the (features, batch) orientation and pad
    # the tiny feature dims (3 inputs, 2 outputs) to one sublane tile (8).
    w_in_t = jnp.zeros((F, IN_PAD), jnp.float32).at[:, :3].set(w_in_eff.T)
    b_in_t = b_in_eff.T                                    # (F, 1)
    w_hid_t = jnp.transpose(w_hid, (0, 2, 1))              # (L, F, F)
    b_hid_t = jnp.transpose(b_hid, (0, 2, 1))              # (L, F, 1)
    w_out_t = jnp.zeros((OUT_PAD, F), jnp.float32).at[:n_out, :].set(w_out.T)
    b_out_t = jnp.zeros((OUT_PAD, 1), jnp.float32).at[:n_out, :].set(b_out.T)

    # Pad the batch (lane axis) so the grid tiles it exactly.
    n_pad = int(pl.cdiv(N, tm)) * tm
    x_t = jnp.zeros((IN_PAD, n_pad), jnp.float32).at[:3, :N].set(x.T)
    # -----------------------------------------------------------------------

    full = lambda shape: pl.BlockSpec(shape, lambda i: tuple(0 for _ in shape))

    kernel = functools.partial(_mlp_kernel, num_hidden=num_hidden)
    out_t = pl.pallas_call(
        kernel,
        out_shape=jax.ShapeDtypeStruct((OUT_PAD, n_pad), jnp.float32),
        grid_spec=pltpu.PrefetchScalarGridSpec(
            num_scalar_prefetch=0,
            grid=(n_pad // tm,),
            in_specs=[
                full((F, IN_PAD)),                 # w_in  (normalization folded)
                full((F, 1)),                      # b_in
                full((num_hidden, F, F)),          # w_hid stack (transposed)
                full((num_hidden, F, 1)),          # b_hid stack
                full((OUT_PAD, F)),                # w_out (rows padded to 8)
                full((OUT_PAD, 1)),                # b_out (rows padded to 8)
                pl.BlockSpec((IN_PAD, tm), lambda i: (0, i)),   # x (batch tiled on lanes)
            ],
            out_specs=pl.BlockSpec((OUT_PAD, tm), lambda i: (0, i)),
        ),
        compiler_params=pltpu.CompilerParams(
            dimension_semantics=("parallel",)),
    )(w_in_t, b_in_t, w_hid_t, b_hid_t, w_out_t, b_out_t, x_t)

    return out_t[:n_out, :N].T                              # (N, 2)


def init_params(key, num_layers, num_features, lb, ub):
    """Deterministic Xavier-normal weights, zero biases (matches __init__ shapes)."""
    def xavier(k, fan_in, fan_out):
        std = jnp.sqrt(2.0 / (fan_in + fan_out))
        return std * jax.random.normal(k, (fan_in, fan_out), dtype=jnp.float32)

    num_hidden = num_layers - 1          # hidden F->F layers actually used in forward
    keys = jax.random.split(key, 2 + num_hidden)
    w_in = xavier(keys[0], 3, num_features)
    b_in = jnp.zeros((1, num_features), jnp.float32)
    w_hid = jnp.stack([xavier(keys[1 + l], num_features, num_features)
                       for l in range(num_hidden)], axis=0)
    b_hid = jnp.zeros((num_hidden, 1, num_features), jnp.float32)
    w_out = xavier(keys[-1], num_features, 2)
    b_out = jnp.zeros((1, 2), jnp.float32)
    lb = jnp.asarray(lb, jnp.float32).reshape(1, 3)
    ub = jnp.asarray(ub, jnp.float32).reshape(1, 3)
    return (lb, ub, w_in, b_in, w_hid, b_hid, w_out, b_out)


def reference_forward(x, params):
    """Pure-JAX reference mirroring the PyTorch forward (un-folded math)."""
    (lb, ub, w_in, b_in, w_hid, b_hid, w_out, b_out) = params
    h = 2.0 * (x - lb) / (ub - lb) - 1.0
    h = jnp.tanh(h @ w_in + b_in)
    for l in range(w_hid.shape[0]):
        h = jnp.tanh(h @ w_hid[l] + b_hid[l])
    return h @ w_out + b_out


if __name__ == "__main__":
    num_layers = 4       # numLayers
    num_features = 32    # numFeatures (hidden width)
    lb = [-3.0, -3.0, 0.0]   # lower bound for (x, y, t)
    ub = [3.0, 3.0, 1.0]     # upper bound for (x, y, t)
    N = 1000                 # deliberately NOT a multiple of the tile size

    key = jax.random.PRNGKey(0)
    k_params, k_x = jax.random.split(key)
    params = init_params(k_params, num_layers, num_features, lb, ub)

    # inputs: columns are (x, y, t) sampled inside [lb, ub]
    u = jax.random.uniform(k_x, (N, 3), dtype=jnp.float32)
    x = jnp.asarray(lb, jnp.float32) + u * (
        jnp.asarray(ub, jnp.float32) - jnp.asarray(lb, jnp.float32))

    out = schrodinger_forward(x, params, tm=512)   # grid = (2,) parallel steps
    out = jax.block_until_ready(out)

    ref = reference_forward(x, params)
    assert out.shape == (N, 2)
    assert jnp.allclose(out, ref, atol=1e-4, rtol=1e-4), (
        "mismatch vs reference: max abs err = "
        f"{float(jnp.max(jnp.abs(out - ref)))}")

    # TODO(synk): net_uv/net_pde (autograd 2nd derivatives) and the loss
    # functions are training-time utilities, not part of forward(); omitted.
    print("KERNEL_OK")
</pallas_src>

<mosaic_0001>
module attributes {stable_mosaic.version = 11 : i64} {
  func.func @_mlp_kernel(%arg0: i32, %arg1: memref<32x8xf32, #tpu.memory_space<vmem>>, %arg2: memref<32x1xf32, #tpu.memory_space<vmem>>, %arg3: memref<3x32x32xf32, #tpu.memory_space<vmem>>, %arg4: memref<3x32x1xf32, #tpu.memory_space<vmem>>, %arg5: memref<8x32xf32, #tpu.memory_space<vmem>>, %arg6: memref<8x1xf32, #tpu.memory_space<vmem>>, %arg7: memref<8x512xf32, #tpu.memory_space<vmem>>, %arg8: memref<8x512xf32, #tpu.memory_space<vmem>>) attributes {dimension_semantics = [#tpu.dimension_semantics<parallel>], iteration_bounds = array<i64: 2>, scalar_prefetch = 0 : i64, scratch_operands = 0 : i64, tpu.core_type = #tpu.core_type<tc>, window_params = [{pipeline_mode = #tpu.pipeline_mode<synchronous>, transform_indices = @transform_0, window_bounds = array<i64: 32, 8>}, {pipeline_mode = #tpu.pipeline_mode<synchronous>, transform_indices = @transform_1, window_bounds = array<i64: 32, 1>}, {pipeline_mode = #tpu.pipeline_mode<synchronous>, transform_indices = @transform_2, window_bounds = array<i64: 3, 32, 32>}, {pipeline_mode = #tpu.pipeline_mode<synchronous>, transform_indices = @transform_3, window_bounds = array<i64: 3, 32, 1>}, {pipeline_mode = #tpu.pipeline_mode<synchronous>, transform_indices = @transform_4, window_bounds = array<i64: 8, 32>}, {pipeline_mode = #tpu.pipeline_mode<synchronous>, transform_indices = @transform_5, window_bounds = array<i64: 8, 1>}, {transform_indices = @transform_6, window_bounds = array<i64: 8, 512>}, {transform_indices = @transform_7, window_bounds = array<i64: 8, 512>}]} {
    %c0 = arith.constant 0 : index
    %c0_0 = arith.constant 0 : index
    %0 = vector.load %arg1[%c0, %c0_0] : memref<32x8xf32, #tpu.memory_space<vmem>>, vector<32x8xf32>
    %c0_1 = arith.constant 0 : index
    %c0_2 = arith.constant 0 : index
    %1 = vector.load %arg7[%c0_1, %c0_2] : memref<8x512xf32, #tpu.memory_space<vmem>>, vector<8x512xf32>
    %cst = arith.constant dense<0.000000e+00> : vector<32x512xf32>
    %2 = tpu.matmul %0, %1, %cst {dimension_numbers = #tpu.dot_dimension_numbers<[1], [0], [0], [1], [0, 0, 1, 1], [], []>} : vector<32x8xf32>, vector<8x512xf32>, vector<32x512xf32> -> vector<32x512xf32>
    %c0_3 = arith.constant 0 : index
    %c0_4 = arith.constant 0 : index
    %3 = vector.load %arg2[%c0_3, %c0_4] : memref<32x1xf32, #tpu.memory_space<vmem>>, vector<32x1xf32>
    %4 = vector.broadcast %3 : vector<32x1xf32> to vector<32x512xf32>
    %5 = arith.addf %2, %4 : vector<32x512xf32>
    %6 = math.tanh %5 : vector<32x512xf32>
    %c0_5 = arith.constant 0 : index
    %c0_6 = arith.constant 0 : index
    %c0_7 = arith.constant 0 : index
    %7 = vector.load %arg3[%c0_5, %c0_6, %c0_7] : memref<3x32x32xf32, #tpu.memory_space<vmem>>, vector<1x32x32xf32>
    %8 = vector.shape_cast %7 : vector<1x32x32xf32> to vector<32x32xf32>
    %cst_8 = arith.constant dense<0.000000e+00> : vector<32x512xf32>
    %9 = tpu.matmul %8, %6, %cst_8 {dimension_numbers = #tpu.dot_dimension_numbers<[1], [0], [0], [1], [0, 0, 1, 1], [], []>} : vector<32x32xf32>, vector<32x512xf32>, vector<32x512xf32> -> vector<32x512xf32>
    %c0_9 = arith.constant 0 : index
    %c0_10 = arith.constant 0 : index
    %c0_11 = arith.constant 0 : index
    %10 = vector.load %arg4[%c0_9, %c0_10, %c0_11] : memref<3x32x1xf32, #tpu.memory_space<vmem>>, vector<1x32x1xf32>
    %11 = vector.shape_cast %10 : vector<1x32x1xf32> to vector<32x1xf32>
    %12 = vector.broadcast %11 : vector<32x1xf32> to vector<32x512xf32>
    %13 = arith.addf %9, %12 : vector<32x512xf32>
    %14 = math.tanh %13 : vector<32x512xf32>
    %c1 = arith.constant 1 : index
    %c0_12 = arith.constant 0 : index
    %c0_13 = arith.constant 0 : index
    %15 = vector.load %arg3[%c1, %c0_12, %c0_13] : memref<3x32x32xf32, #tpu.memory_space<vmem>>, vector<1x32x32xf32>
    %16 = vector.shape_cast %15 : vector<1x32x32xf32> to vector<32x32xf32>
    %cst_14 = arith.constant dense<0.000000e+00> : vector<32x512xf32>
    %17 = tpu.matmul %16, %14, %cst_14 {dimension_numbers = #tpu.dot_dimension_numbers<[1], [0], [0], [1], [0, 0, 1, 1], [], []>} : vector<32x32xf32>, vector<32x512xf32>, vector<32x512xf32> -> vector<32x512xf32>
    %c1_15 = arith.constant 1 : index
    %c0_16 = arith.constant 0 : index
    %c0_17 = arith.constant 0 : index
    %18 = vector.load %arg4[%c1_15, %c0_16, %c0_17] : memref<3x32x1xf32, #tpu.memory_space<vmem>>, vector<1x32x1xf32>
    %19 = vector.shape_cast %18 : vector<1x32x1xf32> to vector<32x1xf32>
    %20 = vector.broadcast %19 : vector<32x1xf32> to vector<32x512xf32>
    %21 = arith.addf %17, %20 : vector<32x512xf32>
    %22 = math.tanh %21 : vector<32x512xf32>
    %c2 = arith.constant 2 : index
    %c0_18 = arith.constant 0 : index
    %c0_19 = arith.constant 0 : index
    %23 = vector.load %arg3[%c2, %c0_18, %c0_19] : memref<3x32x32xf32, #tpu.memory_space<vmem>>, vector<1x32x32xf32>
    %24 = vector.shape_cast %23 : vector<1x32x32xf32> to vector<32x32xf32>
    %cst_20 = arith.constant dense<0.000000e+00> : vector<32x512xf32>
    %25 = tpu.matmul %24, %22, %cst_20 {dimension_numbers = #tpu.dot_dimension_numbers<[1], [0], [0], [1], [0, 0, 1, 1], [], []>} : vector<32x32xf32>, vector<32x512xf32>, vector<32x512xf32> -> vector<32x512xf32>
    %c2_21 = arith.constant 2 : index
    %c0_22 = arith.constant 0 : index
    %c0_23 = arith.constant 0 : index
    %26 = vector.load %arg4[%c2_21, %c0_22, %c0_23] : memref<3x32x1xf32, #tpu.memory_space<vmem>>, vector<1x32x1xf32>
    %27 = vector.shape_cast %26 : vector<1x32x1xf32> to vector<32x1xf32>
    %28 = vector.broadcast %27 : vector<32x1xf32> to vector<32x512xf32>
    %29 = arith.addf %25, %28 : vector<32x512xf32>
    %30 = math.tanh %29 : vector<32x512xf32>
    %c0_24 = arith.constant 0 : index
    %c0_25 = arith.constant 0 : index
    %31 = vector.load %arg5[%c0_24, %c0_25] : memref<8x32xf32, #tpu.memory_space<vmem>>, vector<8x32xf32>
    %cst_26 = arith.constant dense<0.000000e+00> : vector<8x512xf32>
    %32 = tpu.matmul %31, %30, %cst_26 {dimension_numbers = #tpu.dot_dimension_numbers<[1], [0], [0], [1], [0, 0, 1, 1], [], []>} : vector<8x32xf32>, vector<32x512xf32>, vector<8x512xf32> -> vector<8x512xf32>
    %c0_27 = arith.constant 0 : index
    %c0_28 = arith.constant 0 : index
    %33 = vector.load %arg6[%c0_27, %c0_28] : memref<8x1xf32, #tpu.memory_space<vmem>>, vector<8x1xf32>
    %34 = vector.broadcast %33 : vector<8x1xf32> to vector<8x512xf32>
    %35 = arith.addf %32, %34 : vector<8x512xf32>
    %c0_29 = arith.constant 0 : index
    %c0_30 = arith.constant 0 : index
    %36 = vector.load %arg8[%c0_29, %c0_30] : memref<8x512xf32, #tpu.memory_space<vmem>>, vector<8x512xf32>
    tpu.vector_store %arg8[%c0_29, %c0_30], %35 {strides = array<i32>} : memref<8x512xf32, #tpu.memory_space<vmem>>, vector<8x512xf32>,
    return
  }
  func.func @transform_0(%arg0: i32) -> (i32, i32) {
    %c0_i32 = arith.constant 0 : i32
    %c0_i32_0 = arith.constant 0 : i32
    %c0_i32_1 = arith.constant 0 : i32
    return %c0_i32, %c0_i32_0 : i32, i32
  }
  func.func @transform_1(%arg0: i32) -> (i32, i32) {
    %c0_i32 = arith.constant 0 : i32
    %c0_i32_0 = arith.constant 0 : i32
    %c0_i32_1 = arith.constant 0 : i32
    return %c0_i32, %c0_i32_0 : i32, i32
  }
  func.func @transform_2(%arg0: i32) -> (i32, i32, i32) {
    %c0_i32 = arith.constant 0 : i32
    %c0_i32_0 = arith.constant 0 : i32
    %c0_i32_1 = arith.constant 0 : i32
    %c0_i32_2 = arith.constant 0 : i32
    return %c0_i32, %c0_i32_0, %c0_i32_1 : i32, i32, i32
  }
  func.func @transform_3(%arg0: i32) -> (i32, i32, i32) {
    %c0_i32 = arith.constant 0 : i32
    %c0_i32_0 = arith.constant 0 : i32
    %c0_i32_1 = arith.constant 0 : i32
    %c0_i32_2 = arith.constant 0 : i32
    return %c0_i32, %c0_i32_0, %c0_i32_1 : i32, i32, i32
  }
  func.func @transform_4(%arg0: i32) -> (i32, i32) {
    %c0_i32 = arith.constant 0 : i32
    %c0_i32_0 = arith.constant 0 : i32
    %c0_i32_1 = arith.constant 0 : i32
    return %c0_i32, %c0_i32_0 : i32, i32
  }
  func.func @transform_5(%arg0: i32) -> (i32, i32) {
    %c0_i32 = arith.constant 0 : i32
    %c0_i32_0 = arith.constant 0 : i32
    %c0_i32_1 = arith.constant 0 : i32
    return %c0_i32, %c0_i32_0 : i32, i32
  }
  func.func @transform_6(%arg0: i32) -> (i32, i32) {
    %c0_i32 = arith.constant 0 : i32
    %c0_i32_0 = arith.constant 0 : i32
    return %c0_i32, %arg0 : i32, i32
  }
  func.func @transform_7(%arg0: i32) -> (i32, i32) {
    %c0_i32 = arith.constant 0 : i32
    %c0_i32_0 = arith.constant 0 : i32
    return %c0_i32, %arg0 : i32, i32
  }
}

</mosaic_0001>

<bundles_post_ra>
// kernel: tpu_custom_call.1
= control target key start
LH: loop header
LB: loop body
LE: loop exit
PB: predicated region body
PF: predicated region fallthrough
CT: control target
= control target key end

     0   :  { %12 = vsyncpa [#allocation3], 0  ;;  %s1775_s0 = inlined_call_operand.vmem [shape: f32[32,8], index: 0, kind: input, shape index: {}]   ;;  %s1776_s1 = inlined_call_operand.vmem [shape: f32[32,1], index: 1, kind: input, shape index: {}]   ;;  %s1777_s2 = inlined_call_operand.vmem [shape: f32[3,32,32], index: 2, kind: input, shape index: {}]   ;;  %s1778_s3 = inlined_call_operand.vmem [shape: f32[3,32,1], index: 3, kind: input, shape index: {}]   ;;  %s1779_s4 = inlined_call_operand.vmem [shape: f32[8,32], index: 4, kind: input, shape index: {}]   ;;  %s1780_s5 = inlined_call_operand.vmem [shape: f32[8,1], index: 5, kind: input, shape index: {}]   ;;  %s1781_s6 = inlined_call_operand.vmem [shape: f32[8,1024], index: 6, kind: input, shape index: {}]   ;;  %s1782_s7 = inlined_call_operand.hbm [shape: f32[8,1024], index: 7, kind: output, shape index: {}]  }
   0x1   :  { %14 = vsyncpa [#allocation3 + $0x1], 0  ;;  %s1521_s24 = smov 0   ;;  %s1523_s25 = smov 0  }
   0x2   :  { %s1525_s26 = smov 0   ;;  %s1527_s27 = smov 0  }
   0x3 LB: > { %s1542_s28 = sadd.s32 4294967295, %s1478_s27   ;;  %s1148_s29 = sadd.s32 4294967294, %s1478_s27   ;;  %s1478_s27 = sphi %s1527_s27, %s1788_s27   ;;  %s1474_s26 = sphi %s1525_s26, %s1787_s26   ;;  %s1470_s25 = sphi %s1523_s25, %s1786_s25   ;;  %s1466_s24 = sphi %s1521_s24, %s1785_s24  }
   0x4   : > { %s1546_s30 = sadd.s32 1, %s1478_s27   ;;  %s179_s8 = sadd.s32 1, %s1474_s26 }
   0x5   : > { %s176_s9 = ssub.s32 %s1478_s27, %s1546_s30  ;;  %p189_p0 = scmp.ne.s32.totalorder %s1474_s26, %s1470_s25 }
   0x6   : > { %p177_p1 = scmp.eq.s32.totalorder %s176_s9, 0  ;;  %p190_p2 = scmp.eq.s32.totalorder %s1542_s28, 1 }
   0x7   : > { %p195_p3 = scmp.ne.s32.totalorder %s1470_s25, %s1466_s24  ;;  %p196_p4 = scmp.eq.s32.totalorder %s1148_s29, 1 }
   0x8   : > { %s1557_s10 = scalar_select %p177_p1, %s1474_s26, %s179_s8  }
   0x9   : > { %p1559_p5 = por %p190_p2, %p189_p0  ;;  %p1563_p6 = por %p196_p4, %p195_p3 }
   0xa   : > { %p1151_p7 = scmp.ge.s32.totalorder %s1478_s27, 1  ;;  %p241_p8 = scmp.lt.s32.totalorder %s1478_s27, 3 }
   0xc   : > { %p242_p9 = pnand %p1151_p7, %p241_p8 }
   0xd   : > { %s1153_s17 = sshll.u32 (!%p242_p9), %s1542_s28, 2  ;;  %s270_s16 = sand.u32 (!%p242_p9), 1, %s1470_s25  }
   0xe   : > { %245 = sbr.rel (%p242_p9) target bundleno = 852 (0x354), region = 48  ;;  %p274_p10 = scmp.lt.s32.totalorder (!%p242_p9), %s1153_s17, 7 }
   0xf   : > { %s1244_s19 = sshll.u32 (!%p242_p9), %s1542_s28, 5  ;;  %s1073_s8 = scalar_lea.sflag (!%p242_p9), [#allocation3], %s270_s16 }
  0x10   : > { %s1084_s22 = scalar_lea.hbm (!%p242_p9), %s1782_s7, %s1244_s19  ;;  %s1436_s15 = scalar_lea.hbm (!%p242_p9), %s1782_s7, 64 }
  0x11   : > { %s1088_s29 = sshll.u32 (!%p242_p9), %s1084_s22, 4  ;;  %s1089_s29 = int_to_ptr.hbm [resolvable:$true] %s1088_s29 }
  0x12   : > { %s1430_s9 = sshra.s32 (!%p242_p9), %s1089_s29, 4  ;;  %s1431_s9 = int_to_ptr.hbm [resolvable:$true] %s1430_s9 }
  0x13   : > { %v291_v0 = vld [vmem:[%s1776_s1 + $0x18] sm:$0xff]  ;;  %v289_v1 = vld [vmem:[%s1776_s1 + $0x8] sm:$0xff]  ;;  %v1480_v2 = vmov 0   ;;  %s1790_s17 = smov (!%p274_p10, %s1153_s17), 7  ;;  %v280_v3 = vld [vmem:[%s1775_s0] sm:$0xff]  ;;  %vm312_vm0 = vcmask 64512   ;;  %p1437_p0 = scmp.lt.s32.totalorder %s1431_s9, %s1782_s7 }
  0x14   : > { %1285 = vset.pattern.permute.xlu0 %v1480_v2  ;;  %1286 = vset.pattern.permute.xlu1 %v1480_v2  ;;  %s1154_s18 = sshll.u32 %s1790_s17, 3  ;;  %v290_v8 = vld [vmem:[%s1776_s1 + $0x10] sm:$0xff]  ;;  %v288_v9 = vld [vmem:[%s1776_s1] sm:$0xff]  ;;  %v281_v10 = vld [vmem:[%s1775_s0 + $0x8] sm:$0xff]  ;;  %vm485_vm1 = vcmask 261120   ;;  %s1152_s17 = sshll.u32 %s270_s16, 5 }
  0x15   : > { %309 = vperm.xlu0 %1285, %v291_v0   ;;  %299 = vperm.xlu1 %1286, %v289_v1   ;;  %s277_s21 = scalar_lea.vmem %s1781_s6, %s1154_s18  ;;  %v462_v11 = vld [vmem:[%s1778_s3 + $0x8] sm:$0xff]  ;;  %v461_v12 = vld [vmem:[%s1778_s3] sm:$0xff]  ;;  %v282_v13 = vld [vmem:[%s1775_s0 + $0x10] sm:$0xff]  ;;  %s272_s18 = scalar_lea.vmem [#allocation2], %s1152_s17 }
  0x16   : > { %1287 = vset.pattern.permute.xlu2 %v1480_v2  ;;  %v284_v4 = vld [vmem:[%s277_s21] sm:$0xff]  ;;  %v285_v5 = vld [vmem:[%s277_s21 + $0x8] sm:$0xff]  ;;  %v286_v6 = vld [vmem:[%s277_s21 + $0x10] sm:$0xff]  ;;  %s1086_s23 = sshll.u32 %s272_s18, 4  ;;  %s1432_s13 = scalar_lea.hbm %s1431_s9, 32  ;;  %s1087_s23 = int_to_ptr.vmem [resolvable:$true] %s1086_s23 }
  0x17   : > { %340 = vmatpush.msra.mxu0 %v284_v4  ;;  %369 = vmatpush.msra.mxu1 %v285_v5  ;;  %v287_v7 = vld [vmem:[%s277_s21 + $0x18] sm:$0xff]  ;;  %v1193_v14 = vld [vmem:[%s1778_s3 + $0x30] sm:$0xff]  ;;  %v1192_v15 = vld [vmem:[%s1778_s3 + $0x28] sm:$0xff]  ;;  %p1433_p11 = scmp.ne.s32.totalorder %s1431_s9, %s1432_s13  ;;  %p1438_p1 = scmp.lt.s32.totalorder %s1436_s15, %s1432_s13 }
  0x18   : > { %398 = vmatpush.msra.mxu2 %v286_v6  ;;  %427 = vmatpush.msra.mxu3 %v287_v7  ;;  %v283_v16 = vld [vmem:[%s1775_s0 + $0x18] sm:$0xff]  ;;  %v1217_v18 = vld [vmem:[%s1778_s3 + $0x50] sm:$0xff]  ;;  %v1215_v19 = vld [vmem:[%s1778_s3 + $0x40] sm:$0xff] }
  0x19   : > { %1155 = vmatmul.msk.f32.vlgmr.msra.gmra.mxu0 %vm312_vm0, %v280_v3  ;;  %1159 = vmatmul.msk.f32.vlgmr.msra.gmra.mxu1 %vm312_vm0, %v280_v3  ;;  %v1218_v17 = vld [vmem:[%s1778_s3 + $0x58] sm:$0xff]  ;;  %v979_v20 = vld [vmem:[%s1780_s5] sm:$0xff]  ;;  %p1434_p12 = pnand %p1433_p11, %p1559_p5  ;;  %p1439_p2 = por %p1438_p1, %p1437_p0 }
  0x1a   : > { %1163 = vmatmul.msk.f32.vlgmr.msra.gmra.mxu2 %vm312_vm0, %v280_v3  ;;  %1167 = vmatmul.msk.f32.vlgmr.msra.gmra.mxu3 %vm312_vm0, %v280_v3  ;;  %v457_v2 = vld [vmem:[%s1777_s2] sm:$0xff]  ;;  %v464_v5 = vld [vmem:[%s1778_s3 + $0x18] sm:$0xff] }
  0x1b   : > { %482 = vperm.xlu2 %1287, %v464_v5   ;;  %p1435_p13 = pneg %p1434_p12 }
  0x1d   : > { %304 = vperm.xlu0 %1285, %v290_v8   ;;  %294 = vperm.xlu1 %1286, %v288_v9   ;;  %p1440_p3 = pnand %p1439_p2, %p1435_p13 }
  0x21   : > { %1156 = vmatmul.msk.f32.gmra.mxu0 %vm312_vm0, %v281_v10  ;;  %1160 = vmatmul.msk.f32.gmra.mxu1 %vm312_vm0, %v281_v10 }
  0x22   : > { %1164 = vmatmul.msk.f32.gmra.mxu2 %vm312_vm0, %v281_v10  ;;  %1168 = vmatmul.msk.f32.gmra.mxu3 %vm312_vm0, %v281_v10 }
  0x25   : > { %472 = vperm.xlu0 %1285, %v462_v11   ;;  %467 = vperm.xlu1 %1286, %v461_v12   ;;  %v458_v11 = vld [vmem:[%s1777_s2 + $0x8] sm:$0xff]  ;;  %v463_v12 = vld [vmem:[%s1778_s3 + $0x10] sm:$0xff] }
  0x26   : > { %477 = vperm.xlu2 %1287, %v463_v12  }
  0x29   : > { %1157 = vmatmul.msk.f32.gmra.mxu0 %vm312_vm0, %v282_v13  ;;  %1161 = vmatmul.msk.f32.gmra.mxu1 %vm312_vm0, %v282_v13 }
  0x2a   : > { %1165 = vmatmul.msk.f32.gmra.mxu2 %vm312_vm0, %v282_v13  ;;  %1169 = vmatmul.msk.f32.gmra.mxu3 %vm312_vm0, %v282_v13  ;;  %v459_v13 = vld [vmem:[%s1777_s2 + $0x10] sm:$0xff] }
  0x2d   : > { %652 = vperm.xlu0 %1285, %v1193_v14   ;;  %647 = vperm.xlu1 %1286, %v1192_v15   ;;  %v1194_v14 = vld [vmem:[%s1778_s3 + $0x38] sm:$0xff] }
  0x2e   : > { %657 = vperm.xlu2 %1287, %v1194_v14   ;;  %v460_v15 = vld [vmem:[%s1777_s2 + $0x18] sm:$0xff] }
  0x31   : > { %1158 = vmatmul.msk.f32.gmra.mxu0 %vm312_vm0, %v283_v16  ;;  %1162 = vmatmul.msk.f32.gmra.mxu1 %vm312_vm0, %v283_v16 }
  0x32   : > { %1166 = vmatmul.msk.f32.gmra.mxu2 %vm312_vm0, %v283_v16  ;;  %1170 = vmatmul.msk.f32.gmra.mxu3 %vm312_vm0, %v283_v16  ;;  %v1191_v16 = vld [vmem:[%s1778_s3 + $0x20] sm:$0xff] }
  0x35   : > { %831 = vperm.xlu0 %1285, %v1218_v17   ;;  %826 = vperm.xlu1 %1286, %v1217_v18   ;;  %v1216_v17 = vld [vmem:[%s1778_s3 + $0x48] sm:$0xff] }
  0x36   : > { %642 = vperm.xlu2 %1287, %v1191_v16  }
  0x3d   : > { %816 = vperm.xlu0 %1285, %v1215_v19   ;;  %982 = vperm.xlu1 %1286, %v979_v20  }
  0x3e   : > { %821 = vperm.xlu2 %1287, %v1216_v17  }
  0x87   : > { %v310_v27 = vpop.permute.xlu0 %309  ;;  %v300_v31 = vpop.permute.xlu1 %299 }
  0x8f   : > { %v305_v38 = vpop.permute.xlu0 %304  ;;  %v295_v43 = vpop.permute.xlu1 %294 }
  0x96   : > { %v342_v21 = vpop.f32.mrf.mxu0  ;;  %v371_v22 = vpop.f32.mrf.mxu1 }
  0x97   : > { %v343_v45 = vadd.f32 %v342_v21, %v295_v43  ;;  %v372_v46 = vadd.f32 %v371_v22, %v295_v43  ;;  %v483_v22 = vpop.permute.xlu2 %482 }
  0x9d   : > { %v400_v23 = vpop.f32.mrf.mxu2  ;;  %v429_v24 = vpop.f32.mrf.mxu3 }
  0x9e   : > { %v345_v25 = vpop.f32.mrf.mxu0  ;;  %v374_v26 = vpop.f32.mrf.mxu1  ;;  %v401_v60 = vadd.f32 %v400_v23, %v295_v43  ;;  %v430_v62 = vadd.f32 %v429_v24, %v295_v43 }
  0x9f   : > { %v346_v33 = vadd.f32 %v345_v25, %v300_v31  ;;  %v375_v34 = vadd.f32 %v374_v26, %v300_v31 }
  0xa1   : > { %1288 = vtanh.f32 %v346_v33 }
  0xa2   : > { %1290 = vtanh.f32 %v375_v34 }
  0xa5   : > { %v403_v28 = vpop.f32.mrf.mxu2  ;;  %v432_v29 = vpop.f32.mrf.mxu3 }
  0xa6   : > { %v348_v30 = vpop.f32.mrf.mxu0  ;;  %v377_v32 = vpop.f32.mrf.mxu1  ;;  %v404_v56 = vadd.f32 %v403_v28, %v300_v31  ;;  %v433_v58 = vadd.f32 %v432_v29, %v300_v31 }
  0xa7   : > { %v349_v41 = vadd.f32 %v348_v30, %v305_v38  ;;  %v378_v44 = vadd.f32 %v377_v32, %v305_v38  ;;  %v1289_v49 = vpop.eup %1288 }
  0xa8   : > { %v1291_v53 = vpop.eup %1290 }
  0xad   : > { %v406_v35 = vpop.f32.mrf.mxu2  ;;  %v435_v36 = vpop.f32.mrf.mxu3 }
  0xae   : > { %v351_v37 = vpop.f32.mrf.mxu0  ;;  %v380_v40 = vpop.f32.mrf.mxu1  ;;  %v407_v50 = vadd.f32 %v406_v35, %v305_v38  ;;  %v436_v54 = vadd.f32 %v435_v36, %v305_v38 }
  0xaf   : > { %v352_v39 = vadd.f32 %v351_v37, %v310_v27  ;;  %v381_v42 = vadd.f32 %v380_v40, %v310_v27  ;;  %v473_v36 = vpop.permute.xlu0 %472  ;;  %v468_v37 = vpop.permute.xlu1 %467 }
  0xb1   : > { %1292 = vtanh.f32 %v352_v39 }
  0xb2   : > { %1294 = vtanh.f32 %v381_v42 }
  0xb3   : > { %1296 = vtanh.f32 %v349_v41 }
  0xb4   : > { %1298 = vtanh.f32 %v378_v44 }
  0xb5   : > { %v409_v47 = vpop.f32.mrf.mxu2  ;;  %v438_v48 = vpop.f32.mrf.mxu3  ;;  %1300 = vtanh.f32 %v343_v45 }
  0xb6   : > { %v410_v51 = vadd.f32 %v409_v47, %v310_v27  ;;  %v439_v52 = vadd.f32 %v438_v48, %v310_v27  ;;  %1302 = vtanh.f32 %v372_v46  ;;  %v478_v27 = vpop.permute.xlu2 %477 }
  0xb7   : > { %v1293_v55 = vpop.eup %1292 }
  0xb8   : > { %1304 = vtanh.f32 %v410_v51  ;;  %v1295_v57 = vpop.eup %1294  ;;  %510 = vmatpush.msrb.mxu0 %v1293_v55 }
  0xb9   : > { %1306 = vtanh.f32 %v439_v52  ;;  %v1297_v59 = vpop.eup %1296  ;;  %539 = vmatpush.msrb.mxu1 %v1295_v57 }
  0xba   : > { %1308 = vtanh.f32 %v407_v50  ;;  %v1299_v61 = vpop.eup %1298  ;;  %511 = vmatpush.msrb.mxu0 %v1297_v59 }
  0xbb   : > { %1310 = vtanh.f32 %v436_v54  ;;  %v1301_v63 = vpop.eup %1300  ;;  %540 = vmatpush.msrb.mxu1 %v1299_v61 }
  0xbc   : > { %1312 = vtanh.f32 %v404_v56  ;;  %v1303_v0 = vpop.eup %1302  ;;  %512 = vmatpush.msrb.mxu0 %v1289_v49  ;;  %v1187_v56 = vld [vmem:[%s1777_s2 + $0x20] sm:$0xff] }
  0xbd   : > { %1314 = vtanh.f32 %v433_v58  ;;  %541 = vmatpush.msrb.mxu1 %v1291_v53 }
  0xbe   : > { %v1305_v1 = vpop.eup %1304  ;;  %1316 = vtanh.f32 %v401_v60  ;;  %513 = vmatpush.msrb.mxu0 %v1301_v63  ;;  %v658_v16 = vpop.permute.xlu2 %657 }
  0xbf   : > { %v1307_v3 = vpop.eup %1306  ;;  %1318 = vtanh.f32 %v430_v62  ;;  %568 = vmatpush.msrb.mxu2 %v1305_v1  ;;  %542 = vmatpush.msrb.mxu1 %v1303_v0  ;;  %v1188_v1 = vld [vmem:[%s1777_s2 + $0x28] sm:$0xff] }
  0xc0   : > { %v1309_v4 = vpop.eup %1308  ;;  %597 = vmatpush.msrb.mxu3 %v1307_v3  ;;  %1171 = vmatmul.msk.f32.vlgmr.msrb.gmra.mxu0 %vm485_vm1, %v457_v2 }
  0xc1   : > { %v1311_v6 = vpop.eup %1310  ;;  %1175 = vmatmul.msk.f32.vlgmr.msrb.gmra.mxu1 %vm485_vm1, %v457_v2  ;;  %569 = vmatpush.msrb.mxu2 %v1309_v4 }
  0xc2   : > { %v1313_v7 = vpop.eup %1312  ;;  %598 = vmatpush.msrb.mxu3 %v1311_v6 }
  0xc3   : > { %v1315_v8 = vpop.eup %1314  ;;  %570 = vmatpush.msrb.mxu2 %v1313_v7 }
  0xc4   : > { %v1317_v9 = vpop.eup %1316  ;;  %599 = vmatpush.msrb.mxu3 %v1315_v8  ;;  %v1189_v8 = vld [vmem:[%s1777_s2 + $0x30] sm:$0xff] }
  0xc5   : > { %v1319_v10 = vpop.eup %1318  ;;  %571 = vmatpush.msrb.mxu2 %v1317_v9  ;;  %v1190_v9 = vld [vmem:[%s1777_s2 + $0x38] sm:$0xff] }
  0xc6   : > { %600 = vmatpush.msrb.mxu3 %v1319_v10  ;;  %1179 = vmatmul.msk.f32.vlgmr.msrb.gmra.mxu2 %vm485_vm1, %v457_v2 }
  0xc7   : > { %1183 = vmatmul.msk.f32.vlgmr.msrb.gmra.mxu3 %vm485_vm1, %v457_v2 }
  0xc8   : > { %1172 = vmatmul.msk.f32.gmra.mxu0 %vm485_vm1, %v458_v11 }
  0xc9   : > { %1176 = vmatmul.msk.f32.gmra.mxu1 %vm485_vm1, %v458_v11 }
  0xce   : > { %1180 = vmatmul.msk.f32.gmra.mxu2 %vm485_vm1, %v458_v11 }
  0xcf   : > { %1184 = vmatmul.msk.f32.gmra.mxu3 %vm485_vm1, %v458_v11 }
  0xd0   : > { %1173 = vmatmul.msk.f32.gmra.mxu0 %vm485_vm1, %v459_v13 }
  0xd1   : > { %1177 = vmatmul.msk.f32.gmra.mxu1 %vm485_vm1, %v459_v13 }
  0xd6   : > { %1181 = vmatmul.msk.f32.gmra.mxu2 %vm485_vm1, %v459_v13 }
  0xd7   : > { %1185 = vmatmul.msk.f32.gmra.mxu3 %vm485_vm1, %v459_v13 }
  0xd8   : > { %1174 = vmatmul.msk.f32.gmra.mxu0 %vm485_vm1, %v460_v15 }
  0xd9   : > { %1178 = vmatmul.msk.f32.gmra.mxu1 %vm485_vm1, %v460_v15 }
  0xde   : > { %1182 = vmatmul.msk.f32.gmra.mxu2 %vm485_vm1, %v460_v15 }
  0xdf   : > { %1186 = vmatmul.msk.f32.gmra.mxu3 %vm485_vm1, %v460_v15 }
 0x13d   : > { %v515_v18 = vpop.f32.mrf.mxu0 }
 0x13e   : > { %v544_v19 = vpop.f32.mrf.mxu1  ;;  %v516_v42 = vadd.f32 %v515_v18, %v468_v37 }
 0x13f   : > { %v545_v43 = vadd.f32 %v544_v19, %v468_v37  ;;  %v653_v19 = vpop.permute.xlu0 %652 }
 0x145   : > { %v518_v20 = vpop.f32.mrf.mxu0 }
 0x146   : > { %v547_v21 = vpop.f32.mrf.mxu1  ;;  %v519_v38 = vadd.f32 %v518_v20, %v473_v36 }
 0x147   : > { %v548_v39 = vadd.f32 %v547_v21, %v473_v36 }
 0x149   : > { %v573_v23 = vpop.f32.mrf.mxu2 }
 0x14a   : > { %v602_v24 = vpop.f32.mrf.mxu3  ;;  %v574_v61 = vadd.f32 %v573_v23, %v468_v37 }
 0x14b   : > { %v603_v62 = vadd.f32 %v602_v24, %v468_v37  ;;  %v648_v24 = vpop.permute.xlu1 %647 }
 0x14d   : > { %v521_v25 = vpop.f32.mrf.mxu0 }
 0x14e   : > { %v550_v26 = vpop.f32.mrf.mxu1  ;;  %v522_v30 = vadd.f32 %v521_v25, %v478_v27 }
 0x14f   : > { %v551_v31 = vadd.f32 %v550_v26, %v478_v27 }
 0x150   : > { %1320 = vtanh.f32 %v522_v30  ;;  %v643_v30 = vpop.permute.xlu2 %642 }
 0x151   : > { %v576_v28 = vpop.f32.mrf.mxu2  ;;  %1322 = vtanh.f32 %v551_v31 }
 0x152   : > { %v605_v29 = vpop.f32.mrf.mxu3  ;;  %v577_v58 = vadd.f32 %v576_v28, %v473_v36 }
 0x153   : > { %v606_v60 = vadd.f32 %v605_v29, %v473_v36 }
 0x155   : > { %v524_v32 = vpop.f32.mrf.mxu0 }
 0x156   : > { %v553_v33 = vpop.f32.mrf.mxu1  ;;  %v525_v34 = vadd.f32 %v524_v32, %v483_v22  ;;  %v1321_v44 = vpop.eup %1320 }
 0x157   : > { %v554_v35 = vadd.f32 %v553_v33, %v483_v22  ;;  %v1323_v45 = vpop.eup %1322 }
 0x158   : > { %1324 = vtanh.f32 %v525_v34 }
 0x159   : > { %1326 = vtanh.f32 %v554_v35  ;;  %v579_v40 = vpop.f32.mrf.mxu2 }
 0x15a   : > { %v608_v41 = vpop.f32.mrf.mxu3  ;;  %1328 = vtanh.f32 %v519_v38  ;;  %v580_v51 = vadd.f32 %v579_v40, %v478_v27 }
 0x15b   : > { %1330 = vtanh.f32 %v548_v39  ;;  %v609_v55 = vadd.f32 %v608_v41, %v478_v27 }
 0x15c   : > { %1332 = vtanh.f32 %v516_v42  ;;  %v1211_v42 = vld [vmem:[%s1777_s2 + $0x40] sm:$0xff] }
 0x15d   : > { %1334 = vtanh.f32 %v545_v43 }
 0x15e   : > { %v1325_v46 = vpop.eup %1324 }
 0x15f   : > { %v1327_v47 = vpop.eup %1326  ;;  %684 = vmatpush.msra.mxu0 %v1325_v46 }
 0x160   : > { %713 = vmatpush.msra.mxu1 %v1327_v47  ;;  %v1329_v50 = vpop.eup %1328 }
 0x161   : > { %v582_v48 = vpop.f32.mrf.mxu2  ;;  %685 = vmatpush.msra.mxu0 %v1321_v44  ;;  %v1331_v54 = vpop.eup %1330 }
 0x162   : > { %v611_v49 = vpop.f32.mrf.mxu3  ;;  %v583_v52 = vadd.f32 %v582_v48, %v483_v22  ;;  %714 = vmatpush.msra.mxu1 %v1323_v45  ;;  %v1333_v57 = vpop.eup %1332 }
 0x163   : > { %v612_v53 = vadd.f32 %v611_v49, %v483_v22  ;;  %686 = vmatpush.msra.mxu0 %v1329_v50  ;;  %v1335_v59 = vpop.eup %1334 }
 0x164   : > { %1336 = vtanh.f32 %v583_v52  ;;  %715 = vmatpush.msra.mxu1 %v1331_v54 }
 0x165   : > { %1338 = vtanh.f32 %v612_v53  ;;  %687 = vmatpush.msra.mxu0 %v1333_v57  ;;  %v1212_v53 = vld [vmem:[%s1777_s2 + $0x48] sm:$0xff] }
 0x166   : > { %1340 = vtanh.f32 %v580_v51  ;;  %716 = vmatpush.msra.mxu1 %v1335_v59  ;;  %1195 = vmatmul.msk.f32.vlgmr.msra.gmra.mxu0 %vm485_vm1, %v1187_v56 }
 0x167   : > { %1342 = vtanh.f32 %v609_v55  ;;  %1199 = vmatmul.msk.f32.vlgmr.msra.gmra.mxu1 %vm485_vm1, %v1187_v56 }
 0x168   : > { %1344 = vtanh.f32 %v577_v58 }
 0x169   : > { %1346 = vtanh.f32 %v606_v60  ;;  %v1213_v60 = vld [vmem:[%s1777_s2 + $0x50] sm:$0xff] }
 0x16a   : > { %v1337_v63 = vpop.eup %1336  ;;  %1348 = vtanh.f32 %v574_v61 }
 0x16b   : > { %v1339_v0 = vpop.eup %1338  ;;  %1350 = vtanh.f32 %v603_v62  ;;  %742 = vmatpush.msra.mxu2 %v1337_v63 }
 0x16c   : > { %v1341_v2 = vpop.eup %1340  ;;  %771 = vmatpush.msra.mxu3 %v1339_v0 }
 0x16d   : > { %v1343_v3 = vpop.eup %1342  ;;  %743 = vmatpush.msra.mxu2 %v1341_v2 }
 0x16e   : > { %v1345_v4 = vpop.eup %1344  ;;  %772 = vmatpush.msra.mxu3 %v1343_v3  ;;  %1196 = vmatmul.msk.f32.gmra.mxu0 %vm485_vm1, %v1188_v1 }
 0x16f   : > { %v1347_v5 = vpop.eup %1346  ;;  %1200 = vmatmul.msk.f32.gmra.mxu1 %vm485_vm1, %v1188_v1  ;;  %744 = vmatpush.msra.mxu2 %v1345_v4 }
 0x170   : > { %v1349_v6 = vpop.eup %1348  ;;  %773 = vmatpush.msra.mxu3 %v1347_v5 }
 0x171   : > { %v1351_v7 = vpop.eup %1350  ;;  %745 = vmatpush.msra.mxu2 %v1349_v6 }
 0x172   : > { %774 = vmatpush.msra.mxu3 %v1351_v7  ;;  %1203 = vmatmul.msk.f32.vlgmr.msra.gmra.mxu2 %vm485_vm1, %v1187_v56 }
 0x173   : > { %1207 = vmatmul.msk.f32.vlgmr.msra.gmra.mxu3 %vm485_vm1, %v1187_v56 }
 0x176   : > { %1197 = vmatmul.msk.f32.gmra.mxu0 %vm485_vm1, %v1189_v8 }
 0x177   : > { %1201 = vmatmul.msk.f32.gmra.mxu1 %vm485_vm1, %v1189_v8 }
 0x17a   : > { %1204 = vmatmul.msk.f32.gmra.mxu2 %vm485_vm1, %v1188_v1 }
 0x17b   : > { %1208 = vmatmul.msk.f32.gmra.mxu3 %vm485_vm1, %v1188_v1  ;;  %v1214_v1 = vld [vmem:[%s1777_s2 + $0x58] sm:$0xff] }
 0x17e   : > { %1198 = vmatmul.msk.f32.gmra.mxu0 %vm485_vm1, %v1190_v9 }
 0x17f   : > { %1202 = vmatmul.msk.f32.gmra.mxu1 %vm485_vm1, %v1190_v9 }
 0x182   : > { %1205 = vmatmul.msk.f32.gmra.mxu2 %vm485_vm1, %v1189_v8 }
 0x183   : > { %1209 = vmatmul.msk.f32.gmra.mxu3 %vm485_vm1, %v1189_v8  ;;  %v832_v8 = vpop.permute.xlu0 %831 }
 0x18a   : > { %1206 = vmatmul.msk.f32.gmra.mxu2 %vm485_vm1, %v1190_v9 }
 0x18b   : > { %1210 = vmatmul.msk.f32.gmra.mxu3 %vm485_vm1, %v1190_v9  ;;  %v827_v9 = vpop.permute.xlu1 %826 }
 0x1e3   : > { %v689_v10 = vpop.f32.mrf.mxu0 }
 0x1e4   : > { %v718_v11 = vpop.f32.mrf.mxu1  ;;  %v690_v32 = vadd.f32 %v689_v10, %v643_v30 }
 0x1e5   : > { %v719_v33 = vadd.f32 %v718_v11, %v643_v30 }
 0x1eb   : > { %v692_v12 = vpop.f32.mrf.mxu0 }
 0x1ec   : > { %v721_v13 = vpop.f32.mrf.mxu1  ;;  %v693_v28 = vadd.f32 %v692_v12, %v648_v24 }
 0x1ed   : > { %v722_v31 = vadd.f32 %v721_v13, %v648_v24 }
 0x1f3   : > { %v695_v14 = vpop.f32.mrf.mxu0 }
 0x1f4   : > { %v724_v15 = vpop.f32.mrf.mxu1  ;;  %v696_v21 = vadd.f32 %v695_v14, %v653_v19 }
 0x1f5   : > { %v747_v17 = vpop.f32.mrf.mxu2  ;;  %v725_v25 = vadd.f32 %v724_v15, %v653_v19 }
 0x1f6   : > { %v776_v18 = vpop.f32.mrf.mxu3  ;;  %v748_v54 = vadd.f32 %v747_v17, %v643_v30 }
 0x1f7   : > { %v777_v55 = vadd.f32 %v776_v18, %v643_v30 }
 0x1fb   : > { %v698_v20 = vpop.f32.mrf.mxu0 }
 0x1fc   : > { %v699_v22 = vadd.f32 %v698_v20, %v658_v16  ;;  %v727_v23 = vpop.f32.mrf.mxu1  ;;  %v817_v20 = vpop.permute.xlu0 %816 }
 0x1fd   : > { %v728_v26 = vadd.f32 %v727_v23, %v658_v16  ;;  %v750_v27 = vpop.f32.mrf.mxu2 }
 0x1fe   : > { %1352 = vtanh.f32 %v699_v22  ;;  %v779_v29 = vpop.f32.mrf.mxu3  ;;  %v751_v51 = vadd.f32 %v750_v27, %v648_v24 }
 0x1ff   : > { %1354 = vtanh.f32 %v728_v26  ;;  %v780_v52 = vadd.f32 %v779_v29, %v648_v24 }
 0x200   : > { %1356 = vtanh.f32 %v696_v21 }
 0x201   : > { %1358 = vtanh.f32 %v725_v25 }
 0x202   : > { %1360 = vtanh.f32 %v693_v28 }
 0x203   : > { %1362 = vtanh.f32 %v722_v31 }
 0x204   : > { %v1353_v34 = vpop.eup %1352  ;;  %1364 = vtanh.f32 %v690_v32  ;;  %v978_v32 = vld [vmem:[%s1779_s4] sm:$0xff] }
 0x205   : > { %v1355_v35 = vpop.eup %1354  ;;  %1366 = vtanh.f32 %v719_v33  ;;  %v753_v36 = vpop.f32.mrf.mxu2  ;;  %858 = vmatpush.msrb.mxu0 %v1353_v34 }
 0x206   : > { %v1357_v37 = vpop.eup %1356  ;;  %v782_v38 = vpop.f32.mrf.mxu3  ;;  %887 = vmatpush.msrb.mxu1 %v1355_v35  ;;  %v754_v46 = vadd.f32 %v753_v36, %v653_v19 }
 0x207   : > { %v1359_v39 = vpop.eup %1358  ;;  %859 = vmatpush.msrb.mxu0 %v1357_v37  ;;  %v783_v49 = vadd.f32 %v782_v38, %v653_v19 }
 0x208   : > { %v1361_v40 = vpop.eup %1360  ;;  %888 = vmatpush.msrb.mxu1 %v1359_v39 }
 0x209   : > { %v1363_v41 = vpop.eup %1362  ;;  %860 = vmatpush.msrb.mxu0 %v1361_v40 }
 0x20a   : > { %v1365_v43 = vpop.eup %1364  ;;  %889 = vmatpush.msrb.mxu1 %v1363_v41 }
 0x20b   : > { %v1367_v44 = vpop.eup %1366  ;;  %861 = vmatpush.msrb.mxu0 %v1365_v43 }
 0x20c   : > { %890 = vmatpush.msrb.mxu1 %v1367_v44  ;;  %1219 = vmatmul.msk.f32.vlgmr.msrb.gmra.mxu0 %vm485_vm1, %v1211_v42 }
 0x20d   : > { %1223 = vmatmul.msk.f32.vlgmr.msrb.gmra.mxu1 %vm485_vm1, %v1211_v42  ;;  %v756_v45 = vpop.f32.mrf.mxu2 }
 0x20e   : > { %v757_v47 = vadd.f32 %v756_v45, %v658_v16  ;;  %v785_v48 = vpop.f32.mrf.mxu3 }
 0x20f   : > { %v786_v50 = vadd.f32 %v785_v48, %v658_v16  ;;  %v822_v16 = vpop.permute.xlu2 %821 }
 0x210   : > { %1368 = vtanh.f32 %v757_v47 }
 0x211   : > { %1370 = vtanh.f32 %v786_v50 }
 0x212   : > { %1372 = vtanh.f32 %v754_v46 }
 0x213   : > { %1374 = vtanh.f32 %v783_v49 }
 0x214   : > { %1376 = vtanh.f32 %v751_v51  ;;  %1220 = vmatmul.msk.f32.gmra.mxu0 %vm485_vm1, %v1212_v53 }
 0x215   : > { %1378 = vtanh.f32 %v780_v52  ;;  %1224 = vmatmul.msk.f32.gmra.mxu1 %vm485_vm1, %v1212_v53 }
 0x216   : > { %v1369_v56 = vpop.eup %1368  ;;  %1380 = vtanh.f32 %v748_v54 }
 0x217   : > { %v1371_v57 = vpop.eup %1370  ;;  %1382 = vtanh.f32 %v777_v55  ;;  %916 = vmatpush.msrb.mxu2 %v1369_v56  ;;  %v983_v55 = vpop.permute.xlu1 %982 }
 0x218   : > { %v1373_v58 = vpop.eup %1372  ;;  %945 = vmatpush.msrb.mxu3 %v1371_v57 }
 0x219   : > { %v1375_v59 = vpop.eup %1374  ;;  %917 = vmatpush.msrb.mxu2 %v1373_v58 }
 0x21a   : > { %v1377_v61 = vpop.eup %1376  ;;  %946 = vmatpush.msrb.mxu3 %v1375_v59 }
 0x21b   : > { %v1379_v62 = vpop.eup %1378  ;;  %918 = vmatpush.msrb.mxu2 %v1377_v61 }
 0x21c   : > { %v1381_v63 = vpop.eup %1380  ;;  %947 = vmatpush.msrb.mxu3 %v1379_v62  ;;  %1221 = vmatmul.msk.f32.gmra.mxu0 %vm485_vm1, %v1213_v60 }
 0x21d   : > { %v1383_v0 = vpop.eup %1382  ;;  %1225 = vmatmul.msk.f32.gmra.mxu1 %vm485_vm1, %v1213_v60  ;;  %919 = vmatpush.msrb.mxu2 %v1381_v63 }
 0x21e   : > { %948 = vmatpush.msrb.mxu3 %v1383_v0  ;;  %1227 = vmatmul.msk.f32.vlgmr.msrb.gmra.mxu2 %vm485_vm1, %v1211_v42 }
 0x21f   : > { %1231 = vmatmul.msk.f32.vlgmr.msrb.gmra.mxu3 %vm485_vm1, %v1211_v42 }
 0x224   : > { %1222 = vmatmul.msk.f32.gmra.mxu0 %vm485_vm1, %v1214_v1 }
 0x225   : > { %1226 = vmatmul.msk.f32.gmra.mxu1 %vm485_vm1, %v1214_v1 }
 0x226   : > { %1228 = vmatmul.msk.f32.gmra.mxu2 %vm485_vm1, %v1212_v53 }
 0x227   : > { %1232 = vmatmul.msk.f32.gmra.mxu3 %vm485_vm1, %v1212_v53 }
 0x22e   : > { %1229 = vmatmul.msk.f32.gmra.mxu2 %vm485_vm1, %v1213_v60 }
 0x22f   : > { %1233 = vmatmul.msk.f32.gmra.mxu3 %vm485_vm1, %v1213_v60 }
 0x236   : > { %1230 = vmatmul.msk.f32.gmra.mxu2 %vm485_vm1, %v1214_v1 }
 0x237   : > { %1234 = vmatmul.msk.f32.gmra.mxu3 %vm485_vm1, %v1214_v1 }
 0x289   : > { %v863_v2 = vpop.f32.mrf.mxu0 }
 0x28a   : > { %v892_v3 = vpop.f32.mrf.mxu1  ;;  %v864_v22 = vadd.f32 %v863_v2, %v817_v20 }
 0x28b   : > { %v893_v23 = vadd.f32 %v892_v3, %v817_v20 }
 0x291   : > { %v866_v4 = vpop.f32.mrf.mxu0 }
 0x292   : > { %v895_v5 = vpop.f32.mrf.mxu1  ;;  %v867_v19 = vadd.f32 %v866_v4, %v822_v16 }
 0x293   : > { %v896_v21 = vadd.f32 %v895_v5, %v822_v16 }
 0x299   : > { %v869_v6 = vpop.f32.mrf.mxu0 }
 0x29a   : > { %v898_v7 = vpop.f32.mrf.mxu1  ;;  %v870_v12 = vadd.f32 %v869_v6, %v827_v9 }
 0x29b   : > { %v899_v17 = vadd.f32 %v898_v7, %v827_v9 }
 0x2a1   : > { %v872_v10 = vpop.f32.mrf.mxu0  ;;  %v921_v11 = vpop.f32.mrf.mxu2 }
 0x2a2   : > { %v873_v13 = vadd.f32 %v872_v10, %v832_v8  ;;  %v901_v14 = vpop.f32.mrf.mxu1  ;;  %v950_v15 = vpop.f32.mrf.mxu3  ;;  %v922_v45 = vadd.f32 %v921_v11, %v817_v20 }
 0x2a3   : > { %v902_v18 = vadd.f32 %v901_v14, %v832_v8  ;;  %v951_v46 = vadd.f32 %v950_v15, %v817_v20 }
 0x2a4   : > { %1384 = vtanh.f32 %v873_v13 }
 0x2a5   : > { %1386 = vtanh.f32 %v902_v18 }
 0x2a6   : > { %1388 = vtanh.f32 %v870_v12 }
 0x2a7   : > { %1390 = vtanh.f32 %v899_v17 }
 0x2a8   : > { %1392 = vtanh.f32 %v867_v19 }
 0x2a9   : > { %1394 = vtanh.f32 %v896_v21  ;;  %v924_v24 = vpop.f32.mrf.mxu2 }
 0x2aa   : > { %v1385_v25 = vpop.eup %1384  ;;  %1396 = vtanh.f32 %v864_v22  ;;  %v953_v26 = vpop.f32.mrf.mxu3  ;;  %v925_v43 = vadd.f32 %v924_v24, %v822_v16 }
 0x2ab   : > { %v1387_v27 = vpop.eup %1386  ;;  %1398 = vtanh.f32 %v893_v23  ;;  %1000 = vmatpush.msra.mxu0 %v1385_v25  ;;  %v954_v44 = vadd.f32 %v953_v26, %v822_v16 }
 0x2ac   : > { %v1389_v28 = vpop.eup %1388  ;;  %1020 = vmatpush.msra.mxu1 %v1387_v27 }
 0x2ad   : > { %v1391_v29 = vpop.eup %1390  ;;  %1001 = vmatpush.msra.mxu0 %v1389_v28 }
 0x2ae   : > { %v1393_v30 = vpop.eup %1392  ;;  %1021 = vmatpush.msra.mxu1 %v1391_v29 }
 0x2af   : > { %v1395_v31 = vpop.eup %1394  ;;  %1002 = vmatpush.msra.mxu0 %v1393_v30 }
 0x2b0   : > { %v1397_v33 = vpop.eup %1396  ;;  %1022 = vmatpush.msra.mxu1 %v1395_v31 }
 0x2b1   : > { %v1399_v34 = vpop.eup %1398  ;;  %v927_v35 = vpop.f32.mrf.mxu2  ;;  %1003 = vmatpush.msra.mxu0 %v1397_v33 }
 0x2b2   : > { %v956_v36 = vpop.f32.mrf.mxu3  ;;  %1023 = vmatpush.msra.mxu1 %v1399_v34  ;;  %1235 = vmatmul.msk.f32.vlgmr.msra.gmra.mxu0 %vm485_vm1, %v978_v32  ;;  %v928_v38 = vadd.f32 %v927_v35, %v827_v9 }
 0x2b3   : > { %1236 = vmatmul.msk.f32.vlgmr.msra.gmra.mxu1 %vm485_vm1, %v978_v32  ;;  %v957_v41 = vadd.f32 %v956_v36, %v827_v9 }
 0x2b9   : > { %v930_v37 = vpop.f32.mrf.mxu2 }
 0x2ba   : > { %v931_v39 = vadd.f32 %v930_v37, %v832_v8  ;;  %v959_v40 = vpop.f32.mrf.mxu3 }
 0x2bb   : > { %v960_v42 = vadd.f32 %v959_v40, %v832_v8 }
 0x2bc   : > { %1400 = vtanh.f32 %v931_v39 }
 0x2bd   : > { %1402 = vtanh.f32 %v960_v42 }
 0x2be   : > { %1404 = vtanh.f32 %v928_v38 }
 0x2bf   : > { %1406 = vtanh.f32 %v957_v41 }
 0x2c0   : > { %1408 = vtanh.f32 %v925_v43 }
 0x2c1   : > { %1410 = vtanh.f32 %v954_v44 }
 0x2c2   : > { %v1401_v47 = vpop.eup %1400  ;;  %1412 = vtanh.f32 %v922_v45 }
 0x2c3   : > { %v1403_v48 = vpop.eup %1402  ;;  %1414 = vtanh.f32 %v951_v46  ;;  %1040 = vmatpush.msra.mxu2 %v1401_v47 }
 0x2c4   : > { %v1405_v49 = vpop.eup %1404  ;;  %1060 = vmatpush.msra.mxu3 %v1403_v48 }
 0x2c5   : > { %v1407_v50 = vpop.eup %1406  ;;  %1041 = vmatpush.msra.mxu2 %v1405_v49 }
 0x2c6   : > { %v1409_v51 = vpop.eup %1408  ;;  %1061 = vmatpush.msra.mxu3 %v1407_v50 }
 0x2c7   : > { %v1411_v52 = vpop.eup %1410  ;;  %1042 = vmatpush.msra.mxu2 %v1409_v51 }
 0x2c8   : > { %v1413_v53 = vpop.eup %1412  ;;  %1062 = vmatpush.msra.mxu3 %v1411_v52 }
 0x2c9   : > { %v1415_v54 = vpop.eup %1414  ;;  %1043 = vmatpush.msra.mxu2 %v1413_v53 }
 0x2ca   : > { %1063 = vmatpush.msra.mxu3 %v1415_v54  ;;  %1237 = vmatmul.msk.f32.vlgmr.msra.gmra.mxu2 %vm485_vm1, %v978_v32 }
 0x2cb   : > { %1238 = vmatmul.msk.f32.vlgmr.msra.gmra.mxu3 %vm485_vm1, %v978_v32 }
 0x32f   : > { %v1005_v56 = vpop.f32.mrf.mxu0 }
 0x330   : > { %v1006_v57 = vadd.f32 %v1005_v56, %v983_v55  ;;  %v1025_v58 = vpop.f32.mrf.mxu1 }
 0x331   : > { %v1026_v59 = vadd.f32 %v1025_v58, %v983_v55 }
 0x332   : > { %1068 = vst [vmem:[%s272_s18] sm:$0xff] %v1006_v57 }
 0x333   : > { %1069 = vst [vmem:[%s272_s18 + $0x8] sm:$0xff] %v1026_v59 }
 0x34d   : > { %v1045_v60 = vpop.f32.mrf.mxu2 }
 0x34e   : > { %v1046_v61 = vadd.f32 %v1045_v60, %v983_v55  ;;  %v1065_v62 = vpop.f32.mrf.mxu3 }
 0x34f   : > { %v1066_v63 = vadd.f32 %v1065_v62, %v983_v55 }
 0x350   : > { %1070 = vst [vmem:[%s272_s18 + $0x10] sm:$0xff] %v1046_v61 }
 0x351   : > { %1071 = vst [vmem:[%s272_s18 + $0x18] sm:$0xff] %v1066_v63 }
 0x352   : > { %1443 = shalt.err (!%p1440_p3)
}
 0x353   : > { %1245 = dma.vmem_to_hbm [thread:$0]  (%p1559_p5), %s1087_s23, 512, %s1089_s29, %s1073_s8  }
 0x354 PF: > { %p1251_p4 = scmp.ge.s32.totalorder %s1478_s27, 2  ;;  %s1100_s16 = sand.u32 1, %s1466_s24  }
 0x355   : > { %s1101_s18 = scalar_lea.sflag [#allocation3], %s1100_s16 }
 0x356   : > { %p1248_p7 = pnand %p1251_p4, %p1563_p6 }
 0x358   : > { %p1249_p8 = pneg %p1248_p7 }
 0x35a   : > { %1461 = dma.done.wait (%p1249_p8), %s1101_s18, 512  }
 0x35b   : > { %1463 = vsyncadd (%p1249_p8), %s1101_s18, 4294966784  ;;  %p17_p9 = scmp.ge.s32.totalorder %s1546_s30, 4   ;;  %s1785_s24 = smov %s1470_s25 }
 0x35c   : > { %s1786_s25 = smov %s1474_s26  ;;  %s1787_s26 = smov %s1557_s10 }
 0x35d   : > { %s1788_s27 = smov %s1546_s30  ;;  %19 = sbr.rel (!%p17_p9) target bundleno = 3 (0x3), region = 87 }
 0x362   :  { %1107 = vsyncpa [#allocation3], 1 }
 0x363   :  { %1109 = vsyncpa [#allocation3 + $0x1], 1 }

</bundles_post_ra>
